<compile_context>
chip_gen: v5e
topology: v5e:2x2
jax: 0.10.0
libtpu: 0.0.40
codegen_flags: <defaults>
</compile_context>

<pallas_src>
import jax
import jax.numpy as jnp
from jax import lax
from jax.experimental import pallas as pl
from jax.experimental.pallas import tpu as pltpu

EPS = 1e-5  # torch.nn.LayerNorm default


# --------------------------------------------------------------------------- #
# Kernels
# --------------------------------------------------------------------------- #
def _layernorm_f32(x_ref, gb_ref):
    """Two-pass LayerNorm of a (TR, D) block, returned in f32."""
    x = x_ref[...].astype(jnp.float32)                       # (TR, D)
    d_inv = 1.0 / x.shape[-1]
    mu = jnp.sum(x, axis=-1, keepdims=True) * d_inv          # (TR, 1)
    xc = x - mu                                              # (TR, D)
    var = jnp.sum(xc * xc, axis=-1, keepdims=True) * d_inv   # two-pass (torch)
    inv = lax.rsqrt(var + EPS)                               # (TR, 1)
    g = gb_ref[0:1, :].astype(jnp.float32)                   # (1, D)
    b = gb_ref[1:2, :].astype(jnp.float32)                   # (1, D)
    return (xc * inv) * g + b                                # minimal VALU form


def _make_prenorm_kernel(fused_fn=None):
    """LayerNorm (+ optional fused elementwise fn) over the last axis."""

    def kernel(x_ref, gb_ref, y_ref):
        y = _layernorm_f32(x_ref, gb_ref)
        if fused_fn is not None:
            # NOTE: fused_fn must be purely elementwise; anything that mixes
            # rows/positions would be applied per (row_tile, D) block and be
            # silently wrong.
            y = fused_fn(y)
        y_ref[...] = y.astype(y_ref.dtype)

    return kernel


def _make_prenorm_proj_kernel(has_bias):
    """LayerNorm fused with a downstream projection y @ W (+ bias) on the MXU."""

    def kernel(x_ref, gb_ref, w_ref, *rest):
        if has_bias:
            pb_ref, o_ref = rest
        else:
            (o_ref,) = rest
        y = _layernorm_f32(x_ref, gb_ref)                    # (TR, D) f32
        w = w_ref[...]
        out = jnp.dot(y.astype(w.dtype), w,
                      preferred_element_type=jnp.float32)    # (TR, E)
        if has_bias:
            out = out + pb_ref[...].astype(jnp.float32)
        o_ref[...] = out.astype(o_ref.dtype)

    return kernel


# --------------------------------------------------------------------------- #
# Tiling helpers
# --------------------------------------------------------------------------- #
def _round_up(v, m):
    return ((v + m - 1) // m) * m


def _vmem_capacity_bytes():
    try:
        cap = int(getattr(pltpu.get_tpu_info(), "vmem_capacity_bytes", 0))
        if cap > 0:
            return cap
    except Exception:
        pass
    return 64 * 1024 * 1024          # conservative default (v7x per-TC)


def _pick_row_tile(n_rows, per_row_bytes, fixed_bytes, budget_bytes, gran,
                   min_steps=4, max_rows=1024):
    """Largest row tile fitting the budget, keeping >= min_steps grid steps."""
    budget_rows = (budget_bytes - fixed_bytes) // max(per_row_bytes, 1)
    budget_rows = max(gran, (budget_rows // gran) * gran)
    # >= 2 steps per TensorCore on v7x; 512 vs 1024-row tiles are ~equal perf,
    # so shrinking the tile to recover pipeline overlap is essentially free.
    step_rows = max(gran, _round_up(pl.cdiv(n_rows, min_steps), gran))
    row_tile = min(budget_rows, step_rows, max_rows)
    return max(gran, (row_tile // gran) * gran)


# --------------------------------------------------------------------------- #
# Wrapper
# --------------------------------------------------------------------------- #
def prenorm(x, gamma, beta, fn=None, *,
            fuse_fn_elementwise=False,
            proj_weight=None, proj_bias=None,
            fn_flops_per_element=0, fn_transcendentals_per_element=0,
            input_buffers=2):
    """PreNorm.forward: fn(LayerNorm(x)).

    Paths:
      * proj_weight is not None: fused LayerNorm + (y @ W [+ bias]) in one
        kernel (MXU), no HBM round-trip of the normalized activations.
      * fuse_fn_elementwise=True: `fn` must be purely elementwise and
        jnp-traceable; it is applied inside the kernel.
      * otherwise: LayerNorm kernel + `fn` (arbitrary callable) as JAX glue.
    """
    orig_shape = x.shape
    D = orig_shape[-1]
    N = 1
    for s in orig_shape[:-1]:
        N *= s

    xf = x.reshape(N, D)
    gb = jnp.stack([gamma.reshape(D), beta.reshape(D)]).astype(jnp.float32)

    in_bytes = xf.dtype.itemsize
    out_bytes = xf.dtype.itemsize
    gran = {1: 32, 2: 16}.get(in_bytes, 8)       # sublane packing granularity

    cap = _vmem_capacity_bytes()
    budget = int(0.4 * cap)                      # 0.4x capacity on any gen

    project = proj_weight is not None
    if project:
        E = proj_weight.shape[-1]
        has_bias = proj_bias is not None
        w_bytes = proj_weight.dtype.itemsize
        if N >= 512:                             # MXU-aligned tiles when it helps
            gran = max(gran, 256)
        # double-buffered x tile + out tile, f32 temps (x, xc) + f32 acc row
        per_row = 2 * D * in_bytes + 2 * E * out_bytes + 2 * D * 4 + E * 4
        fixed = 2 * (2 * D * 4) + 2 * (D * E * w_bytes) + (2 * E * 4 if has_bias else 0)
    else:
        E = D
        has_bias = False
        per_row = 2 * D * (in_bytes + out_bytes) + 2 * D * 4
        fixed = 2 * (2 * D * 4)

    row_tile = _pick_row_tile(N, per_row, fixed, budget, gran)
    grid = pl.cdiv(N, row_tile)                  # ragged last block: no pad/slice

    # Footprint-derived compiler limit (+~25% headroom), capped at 0.75x capacity.
    footprint = fixed + per_row * row_tile
    vmem_limit = min(max(int(footprint * 1.25) + (4 << 20), 16 << 20),
                     int(0.75 * cap))

    if input_buffers > 2:
        # Optional 3-deep input buffer for v5e small-D exposed-DMA cases.
        x_spec = pl.BlockSpec((row_tile, D), lambda i: (i, 0),
                              pipeline_mode=pl.Buffered(input_buffers))
    else:
        x_spec = pl.BlockSpec((row_tile, D), lambda i: (i, 0))
    gb_spec = pl.BlockSpec((2, D), lambda i: (0, 0))

    ln_flops = 8 * N * D
    transcendentals = N  # one rsqrt per row
    if fuse_fn_elementwise and fn is not None:
        ln_flops += int(fn_flops_per_element) * N * D
        transcendentals += int(fn_transcendentals_per_element) * N * D

    if project:
        o_spec = pl.BlockSpec((row_tile, E), lambda i: (i, 0))
        w_spec = pl.BlockSpec(proj_weight.shape, lambda i: (0, 0))
        in_specs = [x_spec, gb_spec, w_spec]
        operands = [xf, gb, proj_weight]
        if has_bias:
            pb = proj_bias.reshape(1, E)
            in_specs.append(pl.BlockSpec((1, E), lambda i: (0, 0)))
            operands.append(pb)
        cost = pl.CostEstimate(
            flops=int(ln_flops + 2 * N * D * E),
            transcendentals=int(transcendentals),
            bytes_accessed=int(N * D * in_bytes + N * E * out_bytes
                               + 2 * D * 4 + D * E * w_bytes),
        )
        kernel = _make_prenorm_proj_kernel(has_bias)
        out = pl.pallas_call(
            kernel,
            out_shape=jax.ShapeDtypeStruct((N, E), x.dtype),
            grid_spec=pltpu.PrefetchScalarGridSpec(
                num_scalar_prefetch=0, grid=(grid,),
                in_specs=in_specs, out_specs=o_spec),
            compiler_params=pltpu.CompilerParams(
                dimension_semantics=("parallel",),
                vmem_limit_bytes=vmem_limit),
            cost_estimate=cost,
        )(*operands)
        return out.reshape(orig_shape[:-1] + (E,))

    cost = pl.CostEstimate(
        flops=int(ln_flops),
        transcendentals=int(transcendentals),
        bytes_accessed=int(N * D * (in_bytes + out_bytes) + 2 * D * 4),
    )
    kernel = _make_prenorm_kernel(fn if fuse_fn_elementwise else None)
    y = pl.pallas_call(
        kernel,
        out_shape=jax.ShapeDtypeStruct((N, D), x.dtype),
        grid_spec=pltpu.PrefetchScalarGridSpec(
            num_scalar_prefetch=0, grid=(grid,),
            in_specs=[x_spec, gb_spec], out_specs=x_spec
            if input_buffers <= 2 else pl.BlockSpec((row_tile, D), lambda i: (i, 0))),
        compiler_params=pltpu.CompilerParams(
            dimension_semantics=("parallel",),
            vmem_limit_bytes=vmem_limit),
        cost_estimate=cost,
    )(xf, gb)
    y = y.reshape(orig_shape)
    if fuse_fn_elementwise or fn is None:
        return y
    # TODO(synk): arbitrary non-elementwise / non-linear `fn` (full attention,
    #             multi-layer MLP, ...) has no single-kernel equivalent here;
    #             it stays as plain JAX glue on the normalized activations.
    return fn(y)


# --------------------------------------------------------------------------- #
# Reference & tests
# --------------------------------------------------------------------------- #
def _layernorm_ref(x, gamma, beta):
    xf = x.astype(jnp.float32)
    mu = jnp.mean(xf, axis=-1, keepdims=True)
    var = jnp.mean((xf - mu) ** 2, axis=-1, keepdims=True)
    return ((xf - mu) * lax.rsqrt(var + EPS)) * gamma + beta


if __name__ == "__main__":
    B, S, D, E = 2, 8, 128, 32
    key = jax.random.PRNGKey(0)
    k1, k2, k3, k4, k5 = jax.random.split(key, 5)

    x = jax.random.normal(k1, (B, S, D), dtype=jnp.float32)
    # nn.LayerNorm init is weight=1, bias=0; perturb to exercise the affine path.
    gamma = 1.0 + 0.1 * jax.random.normal(k2, (D,), dtype=jnp.float32)
    beta = 0.1 * jax.random.normal(k3, (D,), dtype=jnp.float32)

    ln_ref = lambda a: _layernorm_ref(a, gamma, beta)

    # --- Path 1: elementwise fn (GELU) fused in-kernel (no HBM round-trip) ---
    out1 = jax.block_until_ready(
        prenorm(x, gamma, beta, jax.nn.gelu, fuse_fn_elementwise=True,
                fn_flops_per_element=8, fn_transcendentals_per_element=1))
    assert out1.shape == (B, S, D)
    assert float(jnp.max(jnp.abs(out1 - jax.nn.gelu(ln_ref(x))))) < 2e-4

    # --- Path 2: fused downstream projection (PreNorm -> Linear on the MXU) ---
    W = 0.05 * jax.random.normal(k4, (D, E), dtype=jnp.float32)
    bproj = 0.1 * jax.random.normal(k5, (E,), dtype=jnp.float32)
    out2 = jax.block_until_ready(
        prenorm(x, gamma, beta, proj_weight=W, proj_bias=bproj))
    ref2 = jnp.einsum("bsd,de->bse", ln_ref(x), W) + bproj
    assert out2.shape == (B, S, E)
    assert float(jnp.max(jnp.abs(out2 - ref2))) < 2e-2   # MXU default precision

    # --- Path 3: ragged row count (N % row_tile != 0), no wrapper pad/slice ---
    x3 = jax.random.normal(k1, (2, 9, D), dtype=jnp.float32)
    out3 = jax.block_until_ready(prenorm(x3, gamma, beta))
    assert out3.shape == x3.shape
    assert float(jnp.max(jnp.abs(out3 - ln_ref(x3)))) < 2e-4

    print("KERNEL_OK")
</pallas_src>

<mosaic_0001>
module attributes {stable_mosaic.version = 11 : i64} {
  func.func @kernel(%arg0: i32, %arg1: memref<8x128xf32, #tpu.memory_space<vmem>>, %arg2: memref<2x128xf32, #tpu.memory_space<vmem>>, %arg3: memref<8x128xf32, #tpu.memory_space<vmem>>) attributes {dimension_semantics = [#tpu.dimension_semantics<parallel>], iteration_bounds = array<i64: 2>, scalar_prefetch = 0 : i64, scratch_operands = 0 : i64, tpu.core_type = #tpu.core_type<tc>, window_params = [{transform_indices = @transform_0, window_bounds = array<i64: 8, 128>}, {pipeline_mode = #tpu.pipeline_mode<synchronous>, transform_indices = @transform_1, window_bounds = array<i64: 2, 128>}, {transform_indices = @transform_2, window_bounds = array<i64: 8, 128>}]} {
    %c0 = arith.constant 0 : index
    %c0_0 = arith.constant 0 : index
    %0 = vector.load %arg1[%c0, %c0_0] : memref<8x128xf32, #tpu.memory_space<vmem>>, vector<8x128xf32>
    %cst = arith.constant dense<0.000000e+00> : vector<8xf32>
    %1 = vector.multi_reduction <add>, %0, %cst [1] : vector<8x128xf32> to vector<8xf32>
    %2 = vector.shape_cast %1 : vector<8xf32> to vector<8x1xf32>
    %cst_1 = arith.constant 7.812500e-03 : f32
    %3 = vector.broadcast %cst_1 : f32 to vector<8x1xf32>
    %4 = arith.mulf %2, %3 : vector<8x1xf32>
    %5 = vector.broadcast %4 : vector<8x1xf32> to vector<8x128xf32>
    %6 = arith.subf %0, %5 : vector<8x128xf32>
    %7 = arith.mulf %6, %6 : vector<8x128xf32>
    %cst_2 = arith.constant dense<0.000000e+00> : vector<8xf32>
    %8 = vector.multi_reduction <add>, %7, %cst_2 [1] : vector<8x128xf32> to vector<8xf32>
    %9 = vector.shape_cast %8 : vector<8xf32> to vector<8x1xf32>
    %cst_3 = arith.constant 7.812500e-03 : f32
    %10 = vector.broadcast %cst_3 : f32 to vector<8x1xf32>
    %11 = arith.mulf %9, %10 : vector<8x1xf32>
    %cst_4 = arith.constant 9.99999974E-6 : f32
    %12 = vector.broadcast %cst_4 : f32 to vector<8x1xf32>
    %13 = arith.addf %11, %12 : vector<8x1xf32>
    %14 = math.rsqrt %13 : vector<8x1xf32>
    %c0_5 = arith.constant 0 : index
    %c0_6 = arith.constant 0 : index
    %15 = vector.load %arg2[%c0_5, %c0_6] : memref<2x128xf32, #tpu.memory_space<vmem>>, vector<1x128xf32>
    %c1 = arith.constant 1 : index
    %c0_7 = arith.constant 0 : index
    %16 = vector.load %arg2[%c1, %c0_7] : memref<2x128xf32, #tpu.memory_space<vmem>>, vector<1x128xf32>
    %17 = vector.broadcast %14 : vector<8x1xf32> to vector<8x128xf32>
    %18 = arith.mulf %6, %17 : vector<8x128xf32>
    %19 = vector.broadcast %15 : vector<1x128xf32> to vector<8x128xf32>
    %20 = arith.mulf %18, %19 : vector<8x128xf32>
    %21 = vector.broadcast %16 : vector<1x128xf32> to vector<8x128xf32>
    %22 = arith.addf %20, %21 : vector<8x128xf32>
    %23 = arith.mulf %22, %22 : vector<8x128xf32>
    %24 = arith.mulf %22, %23 : vector<8x128xf32>
    %cst_8 = arith.constant 4.471500e-02 : f32
    %25 = vector.broadcast %cst_8 : f32 to vector<8x128xf32>
    %26 = arith.mulf %25, %24 : vector<8x128xf32>
    %27 = arith.addf %22, %26 : vector<8x128xf32>
    %cst_9 = arith.constant 0.797884583 : f32
    %28 = vector.broadcast %cst_9 : f32 to vector<8x128xf32>
    %29 = arith.mulf %28, %27 : vector<8x128xf32>
    %30 = math.tanh %29 : vector<8x128xf32>
    %cst_10 = arith.constant 1.000000e+00 : f32
    %31 = vector.broadcast %cst_10 : f32 to vector<8x128xf32>
    %32 = arith.addf %31, %30 : vector<8x128xf32>
    %cst_11 = arith.constant 5.000000e-01 : f32
    %33 = vector.broadcast %cst_11 : f32 to vector<8x128xf32>
    %34 = arith.mulf %33, %32 : vector<8x128xf32>
    %35 = arith.mulf %22, %34 : vector<8x128xf32>
    %c0_12 = arith.constant 0 : index
    %c0_13 = arith.constant 0 : index
    %36 = vector.load %arg3[%c0_12, %c0_13] : memref<8x128xf32, #tpu.memory_space<vmem>>, vector<8x128xf32>
    tpu.vector_store %arg3[%c0_12, %c0_13], %35 {strides = array<i32>} : memref<8x128xf32, #tpu.memory_space<vmem>>, vector<8x128xf32>,
    return
  }
  func.func @transform_0(%arg0: i32) -> (i32, i32) {
    %c0_i32 = arith.constant 0 : i32
    %c0_i32_0 = arith.constant 0 : i32
    return %arg0, %c0_i32 : i32, i32
  }
  func.func @transform_1(%arg0: i32) -> (i32, i32) {
    %c0_i32 = arith.constant 0 : i32
    %c0_i32_0 = arith.constant 0 : i32
    %c0_i32_1 = arith.constant 0 : i32
    return %c0_i32, %c0_i32_0 : i32, i32
  }
  func.func @transform_2(%arg0: i32) -> (i32, i32) {
    %c0_i32 = arith.constant 0 : i32
    %c0_i32_0 = arith.constant 0 : i32
    return %arg0, %c0_i32 : i32, i32
  }
}

</mosaic_0001>

<bundles_post_ra>
// kernel: tpu_custom_call.1
= control target key start
LH: loop header
LB: loop body
LE: loop exit
PB: predicated region body
PF: predicated region fallthrough
CT: control target
= control target key end

     0   :  { %7 = vsyncpa [#allocation3], 0  ;;  %s676_s0 = inlined_call_operand.hbm [shape: f32[16,128], index: 0, kind: input, shape index: {}]   ;;  %s677_s1 = inlined_call_operand.hbm [shape: f32[2,128], index: 1, kind: input, shape index: {}]   ;;  %s678_s2 = inlined_call_operand.hbm [shape: f32[16,128], index: 2, kind: output, shape index: {}]  }
   0x1   :  { %9 = vsyncpa [#allocation3 + $0x1], 0 }
   0x2   :  { %10 = vsyncpa [#allocation6], 0 }
   0x3   :  { %11 = vsyncpa [#allocation4], 0 }
   0x4   :  { %13 = vsyncpa [#allocation4 + $0x1], 0  ;;  %s534_s9 = smov 0   ;;  %s536_s10 = smov 0  }
   0x5   :  { %s538_s11 = smov 0   ;;  %s540_s12 = smov 0  }
   0x6 LB: > { %s555_s13 = sadd.s32 4294967295, %s516_s12   ;;  %s309_s14 = sadd.s32 4294967294, %s516_s12   ;;  %s516_s12 = sphi %s540_s12, %s688_s12   ;;  %s512_s11 = sphi %s538_s11, %s687_s11   ;;  %s508_s10 = sphi %s536_s10, %s686_s10   ;;  %s504_s9 = sphi %s534_s9, %s685_s9  }
   0x7   : > { %p39_p0 = scmp.ne.s32.totalorder %s508_s10, %s504_s9  ;;  %p40_p1 = scmp.eq.s32.totalorder %s555_s13, 0 }
   0x8   : > { %p84_p2 = scmp.eq.s32.totalorder %s555_s13, 1  ;;  %p90_p3 = scmp.eq.s32.totalorder %s309_s14, 1 }
   0x9   : > { %p564_p4 = por %p40_p1, %p39_p0  ;;  %p310_p5 = scmp.ge.s32.totalorder %s516_s12, 1 }
   0xa   : > { %p569_p6 = por %p90_p3, %p39_p0  ;;  %p97_p7 = scmp.lt.s32.totalorder %s516_s12, 3 }
   0xb   : > { %s109_s19 = sshll.u32 %s677_s1, 4  ;;  %s518_s21 = smov [#allocation5]   ;;  %s110_s19 = int_to_ptr.hbm [resolvable:$true] %s109_s19 }
   0xc   : > { %p577_p8 = pnand %p310_p5, %p97_p7  ;;  %s111_s22 = sshll.u32 %s518_s21, 4  ;;  %s112_s22 = int_to_ptr.vmem [resolvable:$true] %s111_s22 }
   0xd   : > { %s587_s23 = sadd.s32 1, %s516_s12   ;;  %s26_s24 = sadd.s32 1, %s512_s11 }
   0xe   : > { %p331_p10 = pneg %p577_p8  ;;  %s23_s25 = ssub.s32 %s516_s12, %s587_s23 }
   0xf   : > { %p24_p12 = scmp.eq.s32.totalorder %s23_s25, 0  ;;  %p33_p13 = scmp.ne.s32.totalorder %s512_s11, %s508_s10 }
  0x10   : > { %p332_p11 = pnand %p331_p10, %p40_p1  ;;  %p34_p0 = scmp.eq.s32.totalorder %s516_s12, 0 }
  0x11   : > { %s596_s26 = scalar_select %p24_p12, %s512_s11, %s26_s24  }
  0x12   : > { %334 = dma.hbm_to_vmem [thread:$0]  (!%p332_p11), %s110_s19, 32, %s112_s22, [#allocation6]  }
  0x13   : > { %p600_p3 = por %p84_p2, %p33_p13  ;;  %p344_p5 = scmp.lt.s32.totalorder %s516_s12, 2 }
  0x14   : > { %s122_s28 = sand.u32 1, %s512_s11   ;;  %s314_s29 = sshll.u32 %s516_s12, 3 }
  0x15   : > { %p35_p7 = por %p34_p0, %p33_p13  ;;  %s313_s30 = sshll.u32 %s122_s28, 3 }
  0x16   : > { %s130_s5 = scalar_lea.hbm %s676_s0, %s314_s29  ;;  %s126_s7 = scalar_lea.vmem [#allocation2], %s313_s30 }
  0x17   : > { %s132_s6 = sshll.u32 %s130_s5, 4  ;;  %s134_s8 = sshll.u32 %s126_s7, 4  ;;  %s133_s6 = int_to_ptr.hbm [resolvable:$true] %s132_s6  ;;  %s135_s8 = int_to_ptr.vmem [resolvable:$true] %s134_s8 }
  0x18   : > { %p610_p10 = pnand %p344_p5, %p35_p7  ;;  %s123_s17 = scalar_lea.sflag [#allocation3], %s122_s28 }
  0x19   : > { %s416_s18 = sshra.s32 %s133_s6, 4  ;;  %s423_s24 = scalar_lea.hbm %s676_s0, 16  ;;  %s417_s18 = int_to_ptr.hbm [resolvable:$true] %s416_s18 }
  0x1a   : > { %s418_s19 = scalar_lea.hbm %s417_s18, 8  ;;  %p420_p11 = pneg %p610_p10 }
  0x1b   : > { %p419_p2 = scmp.ne.s32.totalorder %s417_s18, %s418_s19  ;;  %p424_p0 = scmp.lt.s32.totalorder %s417_s18, %s676_s0 }
  0x1c   : > { %p425_p5 = scmp.lt.s32.totalorder %s423_s24, %s418_s19 }
  0x1d   : > { %p421_p12 = pnand %p420_p11, %p419_p2 }
  0x1e   : > { %p426_p7 = por %p425_p5, %p424_p0 }
  0x1f   : > { %p422_p13 = pneg %p421_p12 }
  0x21   : > { %p427_p9 = pnand %p426_p7, %p422_p13 }
  0x23   : > { %430 = shalt.err (!%p427_p9)
}
  0x24   : > { %338 = dma.hbm_to_vmem [thread:$0]  (!%p610_p10), %s133_s6, 128, %s135_s8, %s123_s17  }
  0x25   : > { %143 = sbr.rel (%p577_p8) target bundleno = 338 (0x152), region = 28  ;;  %s627_s28 = sand.u32 (!%p577_p8), 1, %s508_s10  }
  0x26   : > { %s316_s30 = sshll.u32 (!%p577_p8), %s627_s28, 3  ;;  %s146_s3 = scalar_lea.sflag (!%p577_p8), [#allocation3], %s627_s28 }
  0x27   : > { %s149_s4 = scalar_lea.vmem (!%p577_p8), [#allocation2], %s316_s30 }
  0x2a   : > { %491 = dma.done.wait (%p564_p4), %s146_s3, 128  }
  0x2b   : > { %493 = vsyncadd (%p564_p4), %s146_s3, 4294967168 }
  0x2c   : > { %495 = dma.done.wait (%p40_p1), [#allocation6], 32  }
  0x2d   : > { %497 = vsyncadd (%p40_p1), [#allocation6], 4294967264  ;;  %v176_v0 = vld [vmem:[%s149_s4] sm:$0xff]  ;;  %v380_v14 = vld [vmem:[#allocation5] ss:$0 sm:$0xff]  ;;  %s320_s15 = sshll.u32 %s555_s13, 3 }
  0x2e   : > { %177 = vadd.xlane.f32.xlu0 %v176_v0  ;;  %v381_v16 = vld [vmem:[#allocation5 + $0x1] ss:$0 sm:$0xff]  ;;  %s224_s6 = scalar_lea.hbm %s678_s2, %s320_s15  ;;  %s175_s7 = scalar_lea.vmem [#allocation7], %s316_s30 }
  0x2f   : > { %s226_s8 = sshll.u32 %s175_s7, 4  ;;  %s228_s14 = sshll.u32 %s224_s6, 4  ;;  %s227_s8 = int_to_ptr.vmem [resolvable:$true] %s226_s8  ;;  %s229_s14 = int_to_ptr.hbm [resolvable:$true] %s228_s14 }
  0x30   : > { %s214_s17 = scalar_lea.sflag [#allocation4], %s627_s28  ;;  %s460_s18 = sshra.s32 %s229_s14, 4  ;;  %s461_s18 = int_to_ptr.hbm [resolvable:$true] %s460_s18 }
  0x31   : > { %s462_s13 = scalar_lea.hbm %s461_s18, 8  ;;  %s466_s22 = scalar_lea.hbm %s678_s2, 16 }
  0x32   : > { %p463_p1 = scmp.ne.s32.totalorder %s461_s18, %s462_s13  ;;  %p467_p9 = scmp.lt.s32.totalorder %s461_s18, %s678_s2 }
  0x33   : > { %p468_p10 = scmp.lt.s32.totalorder %s466_s22, %s462_s13 }
  0x34   : > { %p464_p4 = pnand %p463_p1, %p600_p3 }
  0x35   : > { %p469_p2 = por %p468_p10, %p467_p9 }
  0x36   : > { %p465_p8 = pneg %p464_p4 }
  0x38   : > { %p470_p11 = pnand %p469_p2, %p465_p8 }
  0xa1   : > { %v178_v1 = vpop.xlane.xlu0 %177 }
  0xa2   : > { %v179_v2 = vmul.f32 0.0078125, %v178_v1 }
  0xa4   : > { %v180_v3 = vsub.f32 %v176_v0, %v179_v2 }
  0xa6   : > { %v181_v4 = vmul.f32 %v180_v3, %v180_v3 }
  0xa8   : > { %182 = vadd.xlane.f32.xlu0 %v181_v4 }
 0x11b   : > { %v183_v5 = vpop.xlane.xlu0 %182 }
 0x11c   : > { %v184_v6 = vmul.f32 0.0078125, %v183_v5 }
 0x11e   : > { %v185_v7 = vadd.f32 1e-05, %v184_v6 }
 0x120   : > { %382 = vrsqrt.f32 %v185_v7  ;;  %vm192_vm1 = vweird.f32 %v185_v7 }
 0x126   : > { %v383_v8 = vpop.eup %382 }
 0x127   : > { %v187_v9 = vmul.f32 %v383_v8, %v185_v7  ;;  %vm193_vm0 = vweird.f32 %v383_v8 }
 0x128   : > { %vm194_vm2 = vmor %vm192_vm1, %vm193_vm0 }
 0x129   : > { %v188_v10 = vmul.f32 %v383_v8, %v187_v9 }
 0x12b   : > { %v189_v11 = vmul.f32 0.5, %v188_v10 }
 0x12d   : > { %v190_v12 = vsub.f32 1.5, %v189_v11 }
 0x12f   : > { %v191_v13 = vmul.f32 %v383_v8, %v190_v12 }
 0x131   : > { %v195_v15 = vsel %vm194_vm2, %v383_v8, %v191_v13 }
 0x132   : > { %v198_v17 = vmul.f32 %v195_v15, %v180_v3 }
 0x134   : > { %v200_v18 = vmul.f32 %v380_v14, %v198_v17 }
 0x136   : > { %v202_v19 = vadd.f32 %v381_v16, %v200_v18 }
 0x138   : > { %v203_v20 = vmul.f32 %v202_v19, %v202_v19 }
 0x13a   : > { %v204_v21 = vmul.f32 %v203_v20, %v202_v19 }
 0x13c   : > { %v205_v22 = vmul.f32 0.044715, %v204_v21 }
 0x13e   : > { %v206_v23 = vadd.f32 %v205_v22, %v202_v19 }
 0x140   : > { %v207_v24 = vmul.f32 0.7978846, %v206_v23 }
 0x142   : > { %384 = vtanh.f32 %v207_v24 }
 0x148   : > { %v385_v25 = vpop.eup %384 }
 0x149   : > { %v209_v26 = vadd.f32 1.0, %v385_v25 }
 0x14b   : > { %v210_v27 = vmul.f32 0.5, %v209_v26 }
 0x14d   : > { %v211_v28 = vmul.f32 %v210_v27, %v202_v19 }
 0x14f   : > { %212 = vst [vmem:[%s175_s7] sm:$0xff] %v211_v28 }
 0x150   : > { %473 = shalt.err (!%p470_p11)
}
 0x151   : > { %329 = dma.vmem_to_hbm [thread:$0]  (%p600_p3), %s227_s8, 128, %s229_s14, %s214_s17  }
 0x152 PF: > { %s240_s29 = sand.u32 1, %s504_s9   ;;  %p684_p12 = scmp.ge.s32.totalorder %s516_s12, 2 }
 0x153   : > { %s241_s28 = scalar_lea.sflag [#allocation4], %s240_s29 }
 0x154   : > { %p340_p13 = pnand %p684_p12, %p569_p6 }
 0x156   : > { %p341_p0 = pneg %p340_p13 }
 0x158   : > { %499 = dma.done.wait (%p341_p0), %s241_s28, 128  }
 0x159   : > { %501 = vsyncadd (%p341_p0), %s241_s28, 4294967168  ;;  %p16_p5 = scmp.ge.s32.totalorder %s587_s23, 4   ;;  %s685_s9 = smov %s508_s10 }
 0x15a   : > { %s686_s10 = smov %s512_s11  ;;  %s687_s11 = smov %s596_s26 }
 0x15b   : > { %s688_s12 = smov %s587_s23  ;;  %18 = sbr.rel (!%p16_p5) target bundleno = 6 (0x6), region = 77 }
 0x160   :  { %247 = vsyncpa [#allocation3], 1 }
 0x161   :  { %249 = vsyncpa [#allocation3 + $0x1], 1 }
 0x162   :  { %250 = vsyncpa [#allocation6], 1 }
 0x163   :  { %251 = vsyncpa [#allocation4], 1 }
 0x164   :  { %253 = vsyncpa [#allocation4 + $0x1], 1 }

</bundles_post_ra>
